<compile_context>
chip_gen: v5e
topology: v5e:2x2
jax: 0.10.0
libtpu: 0.0.40
codegen_flags: <defaults>
</compile_context>

<pallas_src>
import functools

import jax
import jax.numpy as jnp
from jax.experimental import pallas as pl
from jax.experimental.pallas import tpu as pltpu

LANES = 128
MAX_ROW_TILE = 2048    # 2048 x 128 f32 = 1 MiB per input block
NUM_SLICES = 2         # leading "parallel" grid axis (both TCs on v7x)


def _dice_kernel(p_ref, t_ref, inter_ref, union_ref, *,
                 rows, row_tile, steps_per_slice, needs_mask):
    j = pl.program_id(1)

    @pl.when(j == 0)
    def _():
        inter_ref[...] = jnp.zeros_like(inter_ref)
        union_ref[...] = jnp.zeros_like(union_ref)

    p = p_ref[...].astype(jnp.float32)
    t = t_ref[...].astype(jnp.float32)
    pt = p * t
    uu = p * p + t * t

    if needs_mask:
        # Zero out rows past the end of the logical array; also neutralizes
        # fully out-of-range blocks whose index was clamped in the index_map.
        s = pl.program_id(0)
        block_start = (s * steps_per_slice + j) * row_tile
        rem = rows - block_start
        row_ids = jax.lax.broadcasted_iota(jnp.int32, (row_tile, LANES), 0)
        valid = row_ids < rem
        pt = jnp.where(valid, pt, 0.0)
        uu = jnp.where(valid, uu, 0.0)

    # VPU-only tree add down to one (8, 128) vreg of partials per quantity.
    inter_ref[...] += pt.reshape(row_tile // 8, 8, LANES).sum(axis=0)
    union_ref[...] += uu.reshape(row_tile // 8, 8, LANES).sum(axis=0)


def _sublane_align(dtype):
    return {4: 8, 2: 16, 1: 32}.get(jnp.dtype(dtype).itemsize, 8)


def dice_coefficient(prediction, target, eps=1e-6):
    """Pallas implementation of DiceCoefficient.forward (returns a scalar f32)."""
    p = prediction.reshape(-1)
    t = target.reshape(-1)
    assert p.shape == t.shape, "prediction and target must have the same #elements"
    n = p.shape[0]
    eps = jnp.float32(eps)

    rows = n // LANES
    tail = n % LANES
    align = max(_sublane_align(p.dtype), _sublane_align(t.dtype))

    if rows < align:
        # Tiny input (less than one native tile of rows): plain JAX is cheapest.
        pf = p.astype(jnp.float32)
        tf = t.astype(jnp.float32)
        inter = jnp.sum(pf * tf)
        union = jnp.sum(pf * pf) + jnp.sum(tf * tf)
        return 2.0 * inter / jnp.maximum(union, eps)

    # Ragged tail (< 128 elements): handled in plain JAX so the kernel never
    # needs a full-array pad/copy pass.
    if tail:
        p_tail = p[rows * LANES:].astype(jnp.float32)
        t_tail = t[rows * LANES:].astype(jnp.float32)
        inter_tail = jnp.sum(p_tail * t_tail)
        union_tail = jnp.sum(p_tail * p_tail) + jnp.sum(t_tail * t_tail)
        p2d = p[: rows * LANES].reshape(rows, LANES)
        t2d = t[: rows * LANES].reshape(rows, LANES)
    else:
        inter_tail = jnp.float32(0.0)
        union_tail = jnp.float32(0.0)
        p2d = p.reshape(rows, LANES)
        t2d = t.reshape(rows, LANES)

    row_tile = min(MAX_ROW_TILE, (rows // align) * align)  # multiple of 8, <= rows
    total_blocks = pl.cdiv(rows, row_tile)
    num_slices = min(NUM_SLICES, total_blocks)
    steps = pl.cdiv(total_blocks, num_slices)
    needs_mask = (num_slices * steps * row_tile) != rows

    def in_map(s, j):
        # Clamp so logically out-of-range blocks stay in bounds; their
        # contribution is zeroed by the in-kernel mask.
        return (jnp.minimum(s * steps + j, total_blocks - 1), 0)

    kernel = functools.partial(
        _dice_kernel, rows=rows, row_tile=row_tile,
        steps_per_slice=steps, needs_mask=needs_mask)

    inter_part, union_part = pl.pallas_call(
        kernel,
        out_shape=(jax.ShapeDtypeStruct((num_slices * 8, LANES), jnp.float32),
                   jax.ShapeDtypeStruct((num_slices * 8, LANES), jnp.float32)),
        grid_spec=pltpu.PrefetchScalarGridSpec(
            num_scalar_prefetch=0,
            grid=(num_slices, steps),
            in_specs=[
                pl.BlockSpec((row_tile, LANES), in_map),
                pl.BlockSpec((row_tile, LANES), in_map),
            ],
            out_specs=[
                pl.BlockSpec((8, LANES), lambda s, j: (s, 0)),
                pl.BlockSpec((8, LANES), lambda s, j: (s, 0)),
            ],
        ),
        compiler_params=pltpu.CompilerParams(
            dimension_semantics=("parallel", "arbitrary"),
        ),
    )(p2d, t2d)

    inter = jnp.sum(inter_part) + inter_tail
    union = jnp.sum(union_part) + union_tail
    return 2.0 * inter / jnp.maximum(union, eps)


if __name__ == "__main__":
    key = jax.random.PRNGKey(0)
    kp, kt = jax.random.split(key)

    # Small segmentation-style inputs: batch=2, channels=4, spatial=16x16.
    prediction = jax.nn.sigmoid(jax.random.normal(kp, (2, 4, 16, 16), jnp.float32))
    target = (jax.random.uniform(kt, (2, 4, 16, 16)) > 0.5).astype(jnp.float32)

    dice = dice_coefficient(prediction, target)
    dice = jax.block_until_ready(dice)

    # Reference check in plain JAX (same math as the PyTorch module).
    inter = jnp.sum(prediction * target)
    union = jnp.maximum(jnp.sum(prediction * prediction) + jnp.sum(target * target), 1e-6)
    ref = 2.0 * inter / union

    assert jnp.allclose(dice, ref, rtol=1e-5, atol=1e-6), (dice, ref)
    print("KERNEL_OK")
</pallas_src>

<mosaic_0001>
module attributes {stable_mosaic.version = 11 : i64} {
  func.func @_dice_kernel(%arg0: i32, %arg1: i32, %arg2: memref<16x128xf32, #tpu.memory_space<vmem>>, %arg3: memref<16x128xf32, #tpu.memory_space<vmem>>, %arg4: memref<8x128xf32, #tpu.memory_space<vmem>>, %arg5: memref<8x128xf32, #tpu.memory_space<vmem>>) attributes {dimension_semantics = [#tpu.dimension_semantics<parallel>, #tpu.dimension_semantics<arbitrary>], iteration_bounds = array<i64: 1, 1>, scalar_prefetch = 0 : i64, scratch_operands = 0 : i64, tpu.core_type = #tpu.core_type<tc>, window_params = [{transform_indices = @transform_0, window_bounds = array<i64: 16, 128>}, {transform_indices = @transform_1, window_bounds = array<i64: 16, 128>}, {transform_indices = @transform_2, window_bounds = array<i64: 8, 128>}, {transform_indices = @transform_3, window_bounds = array<i64: 8, 128>}]} {
    %c0_i32 = arith.constant 0 : i32
    %0 = arith.cmpi eq, %arg1, %c0_i32 : i32
    %1 = arith.extui %0 : i1 to i32
    %c0_i32_0 = arith.constant 0 : i32
    %2 = arith.cmpi ne, %1, %c0_i32_0 : i32
    scf.if %2 {
      %cst_13 = arith.constant 0.000000e+00 : f32
      %19 = vector.broadcast %cst_13 : f32 to vector<8x128xf32>
      %c0_14 = arith.constant 0 : index
      %c0_15 = arith.constant 0 : index
      %20 = vector.load %arg4[%c0_14, %c0_15] : memref<8x128xf32, #tpu.memory_space<vmem>>, vector<8x128xf32>
      tpu.vector_store %arg4[%c0_14, %c0_15], %19 {strides = array<i32>} : memref<8x128xf32, #tpu.memory_space<vmem>>, vector<8x128xf32>,
      %cst_16 = arith.constant 0.000000e+00 : f32
      %21 = vector.broadcast %cst_16 : f32 to vector<8x128xf32>
      %c0_17 = arith.constant 0 : index
      %c0_18 = arith.constant 0 : index
      %22 = vector.load %arg5[%c0_17, %c0_18] : memref<8x128xf32, #tpu.memory_space<vmem>>, vector<8x128xf32>
      tpu.vector_store %arg5[%c0_17, %c0_18], %21 {strides = array<i32>} : memref<8x128xf32, #tpu.memory_space<vmem>>, vector<8x128xf32>,
    } else {
    }
    %c0 = arith.constant 0 : index
    %c0_1 = arith.constant 0 : index
    %3 = vector.load %arg2[%c0, %c0_1] : memref<16x128xf32, #tpu.memory_space<vmem>>, vector<16x128xf32>
    %c0_2 = arith.constant 0 : index
    %c0_3 = arith.constant 0 : index
    %4 = vector.load %arg3[%c0_2, %c0_3] : memref<16x128xf32, #tpu.memory_space<vmem>>, vector<16x128xf32>
    %5 = arith.mulf %3, %4 : vector<16x128xf32>
    %6 = arith.mulf %3, %3 : vector<16x128xf32>
    %7 = arith.mulf %4, %4 : vector<16x128xf32>
    %8 = arith.addf %6, %7 : vector<16x128xf32>
    %c0_4 = arith.constant 0 : index
    %c0_5 = arith.constant 0 : index
    %9 = vector.load %arg4[%c0_4, %c0_5] : memref<8x128xf32, #tpu.memory_space<vmem>>, vector<8x128xf32>
    %10 = vector.shape_cast %5 : vector<16x128xf32> to vector<2x8x128xf32>
    %cst = arith.constant dense<0.000000e+00> : vector<8x128xf32>
    %11 = vector.multi_reduction <add>, %10, %cst [0] : vector<2x8x128xf32> to vector<8x128xf32>
    %12 = arith.addf %9, %11 : vector<8x128xf32>
    %c0_6 = arith.constant 0 : index
    %c0_7 = arith.constant 0 : index
    %13 = vector.load %arg4[%c0_6, %c0_7] : memref<8x128xf32, #tpu.memory_space<vmem>>, vector<8x128xf32>
    tpu.vector_store %arg4[%c0_6, %c0_7], %12 {strides = array<i32>} : memref<8x128xf32, #tpu.memory_space<vmem>>, vector<8x128xf32>,
    %c0_8 = arith.constant 0 : index
    %c0_9 = arith.constant 0 : index
    %14 = vector.load %arg5[%c0_8, %c0_9] : memref<8x128xf32, #tpu.memory_space<vmem>>, vector<8x128xf32>
    %15 = vector.shape_cast %8 : vector<16x128xf32> to vector<2x8x128xf32>
    %cst_10 = arith.constant dense<0.000000e+00> : vector<8x128xf32>
    %16 = vector.multi_reduction <add>, %15, %cst_10 [0] : vector<2x8x128xf32> to vector<8x128xf32>
    %17 = arith.addf %14, %16 : vector<8x128xf32>
    %c0_11 = arith.constant 0 : index
    %c0_12 = arith.constant 0 : index
    %18 = vector.load %arg5[%c0_11, %c0_12] : memref<8x128xf32, #tpu.memory_space<vmem>>, vector<8x128xf32>
    tpu.vector_store %arg5[%c0_11, %c0_12], %17 {strides = array<i32>} : memref<8x128xf32, #tpu.memory_space<vmem>>, vector<8x128xf32>,
    return
  }
  func.func @transform_0(%arg0: i32, %arg1: i32) -> (i32, i32) {
    %c1_i32 = arith.constant 1 : i32
    %0 = arith.muli %arg0, %c1_i32 : i32
    %1 = arith.addi %0, %arg1 : i32
    %c0_i32 = arith.constant 0 : i32
    %2 = arith.minsi %1, %c0_i32 : i32
    %c0_i32_0 = arith.constant 0 : i32
    %c0_i32_1 = arith.constant 0 : i32
    return %2, %c0_i32_0 : i32, i32
  }
  func.func @transform_1(%arg0: i32, %arg1: i32) -> (i32, i32) {
    %c1_i32 = arith.constant 1 : i32
    %0 = arith.muli %arg0, %c1_i32 : i32
    %1 = arith.addi %0, %arg1 : i32
    %c0_i32 = arith.constant 0 : i32
    %2 = arith.minsi %1, %c0_i32 : i32
    %c0_i32_0 = arith.constant 0 : i32
    %c0_i32_1 = arith.constant 0 : i32
    return %2, %c0_i32_0 : i32, i32
  }
  func.func @transform_2(%arg0: i32, %arg1: i32) -> (i32, i32) {
    %c0_i32 = arith.constant 0 : i32
    %c0_i32_0 = arith.constant 0 : i32
    return %arg0, %c0_i32 : i32, i32
  }
  func.func @transform_3(%arg0: i32, %arg1: i32) -> (i32, i32) {
    %c0_i32 = arith.constant 0 : i32
    %c0_i32_0 = arith.constant 0 : i32
    return %arg0, %c0_i32 : i32, i32
  }
}

</mosaic_0001>

<bundles_post_ra>
// kernel: tpu_custom_call.1
= control target key start
LH: loop header
LB: loop body
LE: loop exit
PB: predicated region body
PF: predicated region fallthrough
CT: control target
= control target key end

     0   :  { %9 = vsyncpa [#allocation3], 0  ;;  %s280_s0 = inlined_call_operand.hbm [shape: f32[16,128], index: 0, kind: input, shape index: {}]   ;;  %s281_s1 = inlined_call_operand.hbm [shape: f32[16,128], index: 1, kind: input, shape index: {}]   ;;  %s282_s2 = inlined_call_operand.hbm [shape: f32[8,128], index: 2, kind: output, shape index: {0}]   ;;  %s283_s3 = inlined_call_operand.hbm [shape: f32[8,128], index: 3, kind: output, shape index: {1}]  }
   0x1   :  { %10 = vsyncpa [#allocation6], 0 }
   0x2   :  { %11 = vsyncpa [#allocation4], 0 }
   0x3   :  { %12 = vsyncpa [#allocation9], 0  ;;  %s23_s14 = sshll.u32 %s280_s0, 4  ;;  %s242_s15 = smov [#allocation2]   ;;  %s24_s14 = int_to_ptr.hbm [resolvable:$true] %s23_s14 }
   0x4   :  { %s25_s16 = sshll.u32 %s242_s15, 4  ;;  %s42_s19 = sshll.u32 %s281_s1, 4  ;;  %s26_s16 = int_to_ptr.vmem [resolvable:$true] %s25_s16  ;;  %s43_s19 = int_to_ptr.hbm [resolvable:$true] %s42_s19 }
   0x5   :  { %s243_s20 = smov 128   ;;  %s244_s21 = smov 8  }
   0x6   :  { %31 = dma.hbm_to_vmem [thread:$0]  %s24_s14, 256, %s26_s16, [#allocation3], %s243_s20, %s243_s20, %s244_s21  }
   0x7   :  { %s245_s22 = smov [#allocation5]  }
   0x8   :  { %s44_s23 = sshll.u32 %s245_s22, 4  ;;  %s45_s23 = int_to_ptr.vmem [resolvable:$true] %s44_s23 }
   0x9   :  { %50 = dma.hbm_to_vmem [thread:$0]  %s43_s19, 256, %s45_s23, [#allocation6], %s243_s20, %s243_s20, %s244_s21  }
   0xa   :  { %234 = dma.done.wait [#allocation3], 256  }
   0xb   :  { %235 = vsyncadd [#allocation3], 4294967040 }
   0xc   :  { %236 = dma.done.wait [#allocation6], 256  }
   0xd   :  { %237 = vsyncadd [#allocation6], 4294967040  ;;  %v73_v0 = vld [vmem:[#allocation2] sm:$0xff]  ;;  %v74_v1 = vld [vmem:[#allocation2 + $0x8] sm:$0xff]  ;;  %s246_s0 = smov [#allocation7]   ;;  %s100_s26 = sshll.u32 %s282_s2, 4  ;;  %s101_s26 = int_to_ptr.hbm [resolvable:$true] %s100_s26 }
   0xe   :  { %v75_v2 = vld [vmem:[#allocation5] sm:$0xff]  ;;  %v76_v3 = vld [vmem:[#allocation5 + $0x8] sm:$0xff]  ;;  %v79_v5 = vmul.f32 %v73_v0, %v73_v0  ;;  %v80_v6 = vmul.f32 %v74_v1, %v74_v1  ;;  %s98_s1 = sshll.u32 %s246_s0, 4  ;;  %s247_s27 = smov [#allocation8]   ;;  %s99_s1 = int_to_ptr.vmem [resolvable:$true] %s98_s1 }
   0xf   :  { %v77_v4 = vmul.f32 %v75_v2, %v73_v0  ;;  %v81_v7 = vmul.f32 %v75_v2, %v75_v2  ;;  %v78_v8 = vmul.f32 %v76_v3, %v74_v1  ;;  %v82_v9 = vmul.f32 %v76_v3, %v76_v3  ;;  %s109_s28 = sshll.u32 %s247_s27, 4  ;;  %s111_s4 = sshll.u32 %s283_s3, 4  ;;  %s110_s28 = int_to_ptr.vmem [resolvable:$true] %s109_s28  ;;  %s112_s4 = int_to_ptr.hbm [resolvable:$true] %s111_s4 }
  0x11   :  { %v83_v10 = vadd.f32 %v81_v7, %v79_v5  ;;  %v86_v11 = vadd.f32 %v78_v8, %v77_v4  ;;  %v84_v12 = vadd.f32 %v82_v9, %v80_v6 }
  0x13   :  { %v90_v13 = vadd.f32 %v84_v12, %v83_v10  ;;  %88 = vst [vmem:[#allocation7] sm:$0xff] %v86_v11 }
  0x14   :  { %103 = dma.vmem_to_hbm [thread:$0]  %s99_s1, 128, %s101_s26, [#allocation4]  }
  0x15   :  { %92 = vst [vmem:[#allocation8] sm:$0xff] %v90_v13 }
  0x16   :  { %114 = dma.vmem_to_hbm [thread:$0]  %s110_s28, 128, %s112_s4, [#allocation9]  }
  0x17   :  { %238 = dma.done.wait [#allocation4], 128  }
  0x18   :  { %239 = vsyncadd [#allocation4], 4294967168 }
  0x19   :  { %240 = dma.done.wait [#allocation9], 128  }
  0x1a   :  { %241 = vsyncadd [#allocation9], 4294967168 }
  0x1b   :  { %123 = vsyncpa [#allocation3], 1 }
  0x1c   :  { %124 = vsyncpa [#allocation6], 1 }
  0x1d   :  { %125 = vsyncpa [#allocation4], 1 }
  0x1e   :  { %126 = vsyncpa [#allocation9], 1 }

</bundles_post_ra>
